<compile_context>
chip_gen: v7x
topology: tpu7x:2x2x1
jax: 0.10.0
libtpu: 0.0.40
codegen_flags: <defaults>
</compile_context>

<pallas_src>
import functools

import jax
import jax.numpy as jnp
from jax.experimental import pallas as pl
from jax.experimental.pallas import tpu as pltpu


def _round_up(x, m):
    return ((x + m - 1) // m) * m


def _pick_row_tile(N, C, in_itemsize):
    """Largest row tile that (a) fits a ~20 MiB VMEM budget (double-buffered
    input + ~8 live f32 temporaries per element), (b) is <= 1024 rows, and
    (c) leaves >= ~8 grid steps so v7x megacore / the pipeline stay busy."""
    if N <= 8:
        return N
    per_row_bytes = C * (2 * in_itemsize + 8 * 4)
    tn = (20 * 1024 * 1024) // max(per_row_bytes, 1)
    tn = min(tn, 1024)
    tn = min(tn, _round_up(pl.cdiv(N, 8), 8))   # keep >= ~8 grid steps
    tn = max(8, (tn // 8) * 8)                  # sublane multiple
    return tn


def _pow_static(x, gamma):
    """x ** gamma. Multiply-chain fast path for small non-negative integer
    gamma (avoids the exp+log EUP pair that jnp.power lowers to)."""
    g = float(gamma)
    if g == int(g) and 0 <= int(g) <= 16:
        n = int(g)
        if n == 0:
            return jnp.ones_like(x)
        acc = None
        base = x
        while n:
            if n & 1:
                acc = base if acc is None else acc * base
            n >>= 1
            if n:
                base = base * base
        return acc
    # Non-integer gamma: same behavior as torch.pow (NaN if 1-p < 0), EUP path.
    return jnp.power(x, g)


def _focal_loss_kernel(x_ref, tgt_ref, out_ref, *, label_smoothing, gamma):
    x = x_ref[...].astype(jnp.float32)          # (tn, C) logits, cast in-kernel
    tgt = tgt_ref[...]                          # (tn, 1) int32 targets
    tn, C = x.shape

    # Smoothed one-hot: clamp(onehot, lo, hi) == where(match, hi, lo) since
    # onehot is exactly 0/1.  (Requires the block to span the full class dim.)
    lo = label_smoothing / (C - 1)
    hi = 1.0 - label_smoothing
    cls = jax.lax.broadcasted_iota(jnp.int32, (tn, C), 1)
    smoothed = jnp.where(cls == tgt, hi, lo).astype(jnp.float32)

    # Stable softmax; the per-element divide is replaced by a per-row
    # reciprocal (negligible) + a VPU multiply.  EUP work: 1 exp + 1 log /elem.
    m = jnp.max(x, axis=1, keepdims=True)
    e = jnp.exp(x - m)
    s = jnp.sum(e, axis=1, keepdims=True)
    inv_s = pl.reciprocal(s)                    # exact, shape (tn, 1)
    p = e * inv_s + 1e-07                       # softmax + 1e-7 (module semantics)
    logp = jnp.log(p)                           # log(softmax + 1e-7)

    ce = -logp * smoothed
    fl = _pow_static(1.0 - p, gamma) * ce       # gamma=2 -> (1-p)*(1-p), no pow
    out_ref[...] = jnp.sum(fl, axis=1, keepdims=True)   # (tn, 1) per-row sum


def focal_loss(logits, target, weight=None, *, label_smoothing=0.0, gamma=2.0,
               tn=None):
    """Pallas FocalLoss forward.

    logits: (N, C) float (f32 or bf16 -- cast happens in-kernel),
    target: (N,) int, weight: (C,) float or None.
    """
    N, C = logits.shape
    if tn is None:
        tn = _pick_row_tile(N, C, jnp.dtype(logits.dtype).itemsize)
    tn = int(min(tn, N))
    grid = pl.cdiv(N, tn)

    tgt2d = target.astype(jnp.int32).reshape(N, 1)

    kernel = functools.partial(
        _focal_loss_kernel,
        label_smoothing=float(label_smoothing),
        gamma=float(gamma),
    )

    per_row = pl.pallas_call(
        kernel,
        out_shape=jax.ShapeDtypeStruct((N, 1), jnp.float32),
        grid_spec=pltpu.PrefetchScalarGridSpec(
            num_scalar_prefetch=0,
            grid=(grid,),
            in_specs=[
                pl.BlockSpec((tn, C), lambda i: (i, 0)),   # logits rows
                pl.BlockSpec((tn, 1), lambda i: (i, 0)),   # target column
            ],
            out_specs=pl.BlockSpec((tn, 1), lambda i: (i, 0)),
        ),
        compiler_params=pltpu.CompilerParams(
            dimension_semantics=("parallel",),
            vmem_limit_bytes=32 * 1024 * 1024,   # raise v5e's 16 MiB default
        ),
    )(logits, tgt2d)

    # Cheap O(N) glue: class-weight gather + final mean (moved out of kernel).
    per_row = per_row[:, 0]
    if weight is not None:
        per_row = per_row * weight.astype(jnp.float32)[target]
    return jnp.mean(per_row)


def _focal_loss_ref(logits, target, weight, *, label_smoothing=0.0, gamma=2.0):
    """Pure-JAX reference mirroring the PyTorch module."""
    N, C = logits.shape
    onehot = jax.nn.one_hot(target, C, dtype=jnp.float32)
    smoothed = jnp.clip(onehot, label_smoothing / (C - 1), 1.0 - label_smoothing)
    p = jax.nn.softmax(logits.astype(jnp.float32), axis=1) + 1e-07
    logp = jnp.log(p)
    ce = -logp * smoothed
    fl = jnp.power(1.0 - p, gamma) * ce
    fl = jnp.sum(fl, axis=1) * weight[target]
    return jnp.mean(fl)


if __name__ == "__main__":
    key = jax.random.PRNGKey(0)
    k1, k2, k3, k4, k5, k6 = jax.random.split(key, 6)

    # Test 1: auto-tiled, default gamma=2 (integer fast path), smoothing.
    N, C = 16, 32
    logits = jax.random.normal(k1, (N, C), dtype=jnp.float32)
    target = jax.random.randint(k2, (N,), 0, C, dtype=jnp.int32)
    weight = jax.random.uniform(k3, (C,), dtype=jnp.float32, minval=0.5, maxval=1.5)

    out = focal_loss(logits, target, weight, label_smoothing=0.1, gamma=2.0)
    out = jax.block_until_ready(out)
    ref = _focal_loss_ref(logits, target, weight, label_smoothing=0.1, gamma=2.0)
    assert jnp.allclose(out, ref, rtol=2e-5, atol=1e-6), (out, ref)

    # Test 2: N not divisible by the tile (cdiv grid + masked tail stores),
    # integer gamma=3 multiply chain.
    N2, C2 = 20, 24
    logits2 = jax.random.normal(k4, (N2, C2), dtype=jnp.float32)
    target2 = jax.random.randint(k5, (N2,), 0, C2, dtype=jnp.int32)
    weight2 = jax.random.uniform(k6, (C2,), dtype=jnp.float32, minval=0.5, maxval=1.5)

    out2 = focal_loss(logits2, target2, weight2, label_smoothing=0.05, gamma=3.0, tn=8)
    out2 = jax.block_until_ready(out2)
    ref2 = _focal_loss_ref(logits2, target2, weight2, label_smoothing=0.05, gamma=3.0)
    assert jnp.allclose(out2, ref2, rtol=2e-5, atol=1e-6), (out2, ref2)

    print("KERNEL_OK")
</pallas_src>

<mosaic_0001>
module attributes {stable_mosaic.version = 11 : i64} {
  func.func @_focal_loss_kernel(%arg0: i32, %arg1: memref<8x32xf32, #tpu.memory_space<vmem>>, %arg2: memref<8x1xi32, #tpu.memory_space<vmem>>, %arg3: memref<8x1xf32, #tpu.memory_space<vmem>>) attributes {dimension_semantics = [#tpu.dimension_semantics<parallel>], iteration_bounds = array<i64: 2>, scalar_prefetch = 0 : i64, scratch_operands = 0 : i64, tpu.core_type = #tpu.core_type<tc>, window_params = [{transform_indices = @transform_0, window_bounds = array<i64: 8, 32>}, {transform_indices = @transform_1, window_bounds = array<i64: 8, 1>}, {transform_indices = @transform_2, window_bounds = array<i64: 8, 1>}]} {
    %c0 = arith.constant 0 : index
    %c0_0 = arith.constant 0 : index
    %0 = vector.load %arg1[%c0, %c0_0] : memref<8x32xf32, #tpu.memory_space<vmem>>, vector<8x32xf32>
    %c0_1 = arith.constant 0 : index
    %c0_2 = arith.constant 0 : index
    %1 = vector.load %arg2[%c0_1, %c0_2] : memref<8x1xi32, #tpu.memory_space<vmem>>, vector<8x1xi32>
    %2 = tpu.iota {dimensions = array<i32: 1>} : vector<8x32xi32>
    %3 = vector.broadcast %1 : vector<8x1xi32> to vector<8x32xi32>
    %4 = arith.cmpi eq, %2, %3 : vector<8x32xi32>
    %cst = arith.constant 0.899999976 : f32
    %cst_3 = arith.constant 0.0032258064 : f32
    %5 = vector.broadcast %cst : f32 to vector<8x32xf32>
    %6 = vector.broadcast %cst_3 : f32 to vector<8x32xf32>
    %7 = arith.select %4, %5, %6 : vector<8x32xi1>, vector<8x32xf32>
    %cst_4 = arith.constant dense<0xFF800000> : vector<8xf32>
    %8 = vector.multi_reduction <maximumf>, %0, %cst_4 [1] : vector<8x32xf32> to vector<8xf32>
    %9 = vector.shape_cast %8 : vector<8xf32> to vector<8x1xf32>
    %10 = vector.broadcast %9 : vector<8x1xf32> to vector<8x32xf32>
    %11 = arith.subf %0, %10 : vector<8x32xf32>
    %12 = math.exp %11 : vector<8x32xf32>
    %cst_5 = arith.constant dense<0.000000e+00> : vector<8xf32>
    %13 = vector.multi_reduction <add>, %12, %cst_5 [1] : vector<8x32xf32> to vector<8xf32>
    %14 = vector.shape_cast %13 : vector<8xf32> to vector<8x1xf32>
    %15 = tpu.reciprocal %14 : vector<8x1xf32> -> vector<8x1xf32>
    %16 = vector.broadcast %15 : vector<8x1xf32> to vector<8x32xf32>
    %17 = arith.mulf %12, %16 : vector<8x32xf32>
    %cst_6 = arith.constant 1.000000e-07 : f32
    %18 = vector.broadcast %cst_6 : f32 to vector<8x32xf32>
    %19 = arith.addf %17, %18 : vector<8x32xf32>
    %20 = math.log %19 : vector<8x32xf32>
    %cst_7 = arith.constant 0.000000e+00 : f32
    %21 = vector.broadcast %cst_7 : f32 to vector<8x32xf32>
    %22 = arith.subf %21, %20 : vector<8x32xf32>
    %23 = arith.mulf %22, %7 : vector<8x32xf32>
    %cst_8 = arith.constant 1.000000e+00 : f32
    %24 = vector.broadcast %cst_8 : f32 to vector<8x32xf32>
    %25 = arith.subf %24, %19 : vector<8x32xf32>
    %26 = arith.mulf %25, %25 : vector<8x32xf32>
    %27 = arith.mulf %26, %23 : vector<8x32xf32>
    %cst_9 = arith.constant dense<0.000000e+00> : vector<8xf32>
    %28 = vector.multi_reduction <add>, %27, %cst_9 [1] : vector<8x32xf32> to vector<8xf32>
    %29 = vector.shape_cast %28 : vector<8xf32> to vector<8x1xf32>
    %c0_10 = arith.constant 0 : index
    %c0_11 = arith.constant 0 : index
    %30 = vector.load %arg3[%c0_10, %c0_11] : memref<8x1xf32, #tpu.memory_space<vmem>>, vector<8x1xf32>
    tpu.vector_store %arg3[%c0_10, %c0_11], %29 {strides = array<i32>} : memref<8x1xf32, #tpu.memory_space<vmem>>, vector<8x1xf32>,
    return
  }
  func.func @transform_0(%arg0: i32) -> (i32, i32) {
    %c0_i32 = arith.constant 0 : i32
    %c0_i32_0 = arith.constant 0 : i32
    return %arg0, %c0_i32 : i32, i32
  }
  func.func @transform_1(%arg0: i32) -> (i32, i32) {
    %c0_i32 = arith.constant 0 : i32
    %c0_i32_0 = arith.constant 0 : i32
    return %arg0, %c0_i32 : i32, i32
  }
  func.func @transform_2(%arg0: i32) -> (i32, i32) {
    %c0_i32 = arith.constant 0 : i32
    %c0_i32_0 = arith.constant 0 : i32
    return %arg0, %c0_i32 : i32, i32
  }
}

</mosaic_0001>

<bundles_post_ra>
// kernel: tpu_custom_call.1
= control target key start
LH: loop header
LB: loop body
LE: loop exit
PB: predicated region body
PF: predicated region fallthrough
CT: control target
= control target key end

     0   :  { %s308_s9 = smov 0   ;;  %s336_s0 = inlined_call_operand.vmem [shape: f32[16,32], index: 0, kind: input, shape index: {}]   ;;  %s337_s1 = inlined_call_operand.vmem [shape: s32[16,1], index: 1, kind: input, shape index: {}]   ;;  %s338_s2 = inlined_call_operand.vmem [shape: f32[16,1], index: 2, kind: output, shape index: {}]  }
   0x1 LB: > { %s255_s10 = sadd.s32 4294967295, %s289_s9   ;;  %p259_p0 = scmp.ge.s32.totalorder %s289_s9, 1  ;;  %s289_s9 = sphi %s308_s9, %s12_s9  }
   0x2   : > { %p120_p1 = scmp.lt.s32.totalorder %s289_s9, 3 }
   0x4   : > { %p121_p2 = pnand %p259_p0, %p120_p1 }
   0x5   : > { %p144_p3 = scmp.lt.s32.totalorder (!%p121_p2), %s255_s10, 1  ;;  %vm165_vm0 = vcmask (!%p121_p2), 261120   ;;  %v291_v2 = vmov (!%p121_p2), 0   ;;  %v158_v13 = vlaneseq (!%p121_p2)  ;;  %v292_v19 = vmov (!%p121_p2), 0.0032258064  }
   0x6   : > { %124 = sbr.rel (%p121_p2) target bundleno = 496 (0x1f0), region = 28  ;;  %275 = vset.pattern.permute.xlu1 (!%p121_p2), %v291_v2  ;;  %276 = vset.pattern.permute.xlu0 (!%p121_p2), %v291_v2  ;;  %vm188_vm2 = vcmask (!%p121_p2), 7168  }
   0x7   : > { %v159_v14 = vand.u32 (!%p121_p2), 127, %v158_v13 }
   0xd   : > { %s340_s10 = smov (!%p144_p3, %s255_s10), 1 }
   0xe   : > { %s316_s11 = sshll.u32 %s340_s10, 3 }
   0xf   : > { %s147_s14 = scalar_lea.vmem %s336_s0, %s316_s11  ;;  %s151_s17 = scalar_lea.vmem %s337_s1, %s316_s11 }
  0x10   : > { %v156_v0 = vld [vmem:[%s147_s14] sm:$0xff]  ;;  %s155_s20 = scalar_lea.vmem %s338_s2, %s316_s11 }
  0x11   : > { %v166_v1 = vsel %vm165_vm0, %v156_v0, -inf  ;;  %v157_v3 = vld [vmem:[%s151_s17] sm:$0xff] }
  0x12   : > { %167 = vmax.xlane.f32.xlu0 %v166_v1  ;;  %161 = vperm.xlu1 %275, %v157_v3  }
  0x91   : > { %v162_v15 = vpop.permute.xlu1 %161 }
  0x92   : > { %vm163_vm1 = vcmp.eq.s32.totalorder %v159_v14, %v162_v15 }
  0x93   : > { %v164_v20 = vsel %vm163_vm1, 0.9, %v292_v19 }
  0x9f   : > { %v168_v4 = vpop.xlane.xlu0 %167 }
  0xa0   : > { %v169_v5 = vsub.f32 %v156_v0, %v168_v4 }
  0xa2   : > { %v170_v6 = vmul.f32 1.442695, %v169_v5 }
  0xa4   : > { %277 = vpow2.f32 %v170_v6 }
  0xae   : > { %v278_v7 = vpop.eup %277 }
  0xaf   : > { %v172_v8 = vsel %vm165_vm0, %v278_v7, 0.0 }
  0xb0   : > { %173 = vadd.xlane.f32.xlu0 %v172_v8 }
 0x13d   : > { %v174_v9 = vpop.xlane.xlu0 %173 }
 0x13e   : > { %279 = vrcp.f32 %v174_v9 }
 0x148   : > { %v280_v10 = vpop.eup %279 }
 0x149   : > { %v176_v11 = vmul.f32 %v280_v10, %v278_v7 }
 0x14b   : > { %v177_v12 = vadd.f32 1e-07, %v176_v11 }
 0x14d   : > { %281 = vlog2.f32 %v177_v12  ;;  %v182_v18 = vsub.f32 1.0, %v177_v12 }
 0x14f   : > { %v183_v23 = vmul.f32 %v182_v18, %v182_v18 }
 0x157   : > { %v282_v16 = vpop.eup %281 }
 0x158   : > { %v179_v17 = vmul.f32 0.6931472, %v282_v16 }
 0x15a   : > { %v180_v21 = vsub.f32 0.0, %v179_v17 }
 0x15c   : > { %v181_v22 = vmul.f32 %v180_v21, %v164_v20 }
 0x15e   : > { %v184_v24 = vmul.f32 %v183_v23, %v181_v22 }
 0x160   : > { %v185_v25 = vsel %vm165_vm0, %v184_v24, 0.0 }
 0x161   : > { %186 = vadd.xlane.f32.xlu1 %v185_v25 }
 0x1ee   : > { %v187_v26 = vpop.xlane.xlu1 %186 }
 0x1ef   : > { %189 = vst.msk [vmem:[%s155_s20] sm:$0xff] %vm188_vm2, %v187_v26 }
 0x1f0 PF: > { %s12_s9 = sadd.s32 1, %s289_s9  }
 0x1f1   : > { %p9_p4 = scmp.ge.s32.totalorder %s12_s9, 4  }
 0x1f3   :  { %11 = sbr.rel (!%p9_p4) target bundleno = 1 (0x1), region = 61 }

</bundles_post_ra>
